<compile_context>
chip_gen: v5e
topology: v5e:2x2
jax: 0.10.0
libtpu: 0.0.40
codegen_flags: <defaults>
</compile_context>

<pallas_src>
import functools

import jax
import jax.numpy as jnp
from jax.experimental import pallas as pl
from jax.experimental.pallas import tpu as pltpu


def _round_up(x, m):
    return ((x + m - 1) // m) * m


def _cdiv(a, b):
    return -(-a // b)


def _tpu_defaults():
    """Per-generation (vmem_limit_bytes, tiling_budget_bytes, n_parallel_cores)."""
    try:
        kind = jax.devices()[0].device_kind.lower()
    except Exception:  # no devices / CPU interpret — use conservative defaults
        kind = ""
    if ("v5 lite" in kind) or ("v5e" in kind) or ("v6" in kind):
        # 128 MiB physical VMEM (v5e / v6e): raise the scoped limit so large
        # row tiles compile; leave headroom for Mosaic internal scratch.
        vmem_limit = 100 * 1024 * 1024
        n_cores = 1
    elif "v7" in kind:
        # 64 MiB physical VMEM per TensorCore, 2 TCs per chip.
        vmem_limit = 48 * 1024 * 1024
        n_cores = 2
    else:
        # Unknown / older hardware: conservative.
        vmem_limit = 48 * 1024 * 1024
        n_cores = 2
    budget = vmem_limit - 8 * 1024 * 1024
    return vmem_limit, budget, n_cores


def _pick_tm(M, H, tf, x_itemsize, w_itemsize, out_itemsize, gran, budget,
             use_acc, n_cores, block_rows=None):
    """Largest row tile that fits the VMEM budget (incl. epilogue temporaries)."""
    if block_rows is not None:
        tm = int(block_rows)
    else:
        # Double-buffered weight-slab bytes (independent of tm).
        w_fixed = 2 * (H * 2 * tf + 2 * tf + tf * H + H) * w_itemsize
        tm = gran
        for cand in (1024, 768, 512, 384, 256, 192, 128, 96, 64, 32, 16, 8):
            var = (2 * cand * H * x_itemsize            # x tile, double-buffered
                   + 2 * cand * H * out_itemsize        # out tile, double-buffered
                   + (cand * H * 4 if use_acc else 0)   # f32 accumulator scratch
                   + 2 * cand * 2 * tf * 4)             # f32 epilogue temporaries
            if w_fixed + var <= budget:
                tm = cand
                break
    # Clamp to the problem size (avoid pointless padding work).
    tm = min(tm, _round_up(M, gran))
    # Keep >= n_cores row tiles when M allows, so no TensorCore idles (v7x).
    if n_cores > 1 and M >= n_cores * gran:
        tm = min(tm, _round_up(_cdiv(M, n_cores), gran))
    return max(_round_up(tm, gran), gran)


def _swiglu_kernel_resident(x_ref, w_ug_ref, b_ug_ref, w_out_ref, b_out_ref,
                            o_ref, *, tf):
    """nf == 1: weights stay resident; single fused matmul + epilogue + matmul."""
    x = x_ref[...].astype(w_ug_ref.dtype)                        # bf16 fast path
    ug = jnp.dot(x, w_ug_ref[...], preferred_element_type=jnp.float32)
    ug = ug + b_ug_ref[...]                                      # (tm, 2*tf) f32
    h_in = ug[:, :tf]
    gate = ug[:, tf:]
    act = (h_in * jax.nn.sigmoid(h_in)) * gate                   # silu(h)*g, f32
    out = jnp.dot(act.astype(w_out_ref.dtype), w_out_ref[...],
                  preferred_element_type=jnp.float32)
    o_ref[...] = (out + b_out_ref[...]).astype(o_ref.dtype)


def _swiglu_kernel_tiled(x_ref, w_ug_ref, b_ug_ref, w_out_ref, b_out_ref,
                         o_ref, acc_ref, *, tf):
    """nf > 1: F is the innermost reduction axis; f32 accumulator in VMEM."""
    f = pl.program_id(1)

    @pl.when(f == 0)
    def _():
        acc_ref[...] = jnp.zeros_like(acc_ref)

    x = x_ref[...].astype(w_ug_ref.dtype)                        # bf16 fast path
    # Fused up + gate projection: a single MXU push on an [H, 2*tf] slab.
    ug = jnp.dot(x, w_ug_ref[...], preferred_element_type=jnp.float32)
    ug = ug + b_ug_ref[...]                                      # (tm, 2*tf) f32
    h_in = ug[:, :tf]
    gate = ug[:, tf:]
    act = (h_in * jax.nn.sigmoid(h_in)) * gate                   # silu(h)*g, f32
    # dense_out partial product for this F tile, accumulated in f32.
    acc_ref[...] += jnp.dot(act.astype(w_out_ref.dtype), w_out_ref[...],
                            preferred_element_type=jnp.float32)

    @pl.when(f == pl.num_programs(1) - 1)
    def _():
        o_ref[...] = (acc_ref[...] + b_out_ref[...]).astype(o_ref.dtype)


@functools.partial(jax.jit, static_argnames=("block_rows",))
def swiglu_mlp(x, w_ug_t, b_ug, w_out_t, b_out, block_rows=None):
    """Fused SwiGLU MLP forward.

    x:       [..., H]
    w_ug_t:  [nf, H, 2*tf]  fused (up | gate) weight, pre-transposed + F-tiled
    b_ug:    [nf, 1, 2*tf]  fused (up | gate) bias, tiled like w_ug_t
    w_out_t: [F, H]         dense_out weight, pre-transposed (F = nf * tf)
    b_out:   [1, H]
    """
    orig_shape = x.shape
    H = orig_shape[-1]
    nf, _, two_tf = w_ug_t.shape
    tf = two_tf // 2
    F = nf * tf
    assert w_out_t.shape == (F, H)

    x2d = x.reshape(-1, H)
    M = x2d.shape[0]

    x_itemsize = jnp.dtype(x.dtype).itemsize
    w_itemsize = jnp.dtype(w_ug_t.dtype).itemsize
    out_itemsize = x_itemsize

    # Sublane granularity: 8 rows for 4-byte dtypes, 16 for bf16/fp16, 32 for 8-bit.
    gran = 8 if x_itemsize >= 4 else (16 if x_itemsize == 2 else 32)

    vmem_limit, budget, n_cores = _tpu_defaults()
    use_acc = nf > 1
    tm = _pick_tm(M, H, tf, x_itemsize, w_itemsize, out_itemsize, gran, budget,
                  use_acc, n_cores, block_rows)
    grid_m = pl.cdiv(M, tm)
    m_pad = grid_m * tm
    if m_pad != M:
        x2d = jnp.pad(x2d, ((0, m_pad - M), (0, 0)))

    # Honest HBM traffic: in the tiled path weights are re-streamed once per row
    # tile; in the resident path they are DMA'd exactly once.
    weight_reuse = 1 if nf == 1 else grid_m
    cost = pl.CostEstimate(
        flops=int(6 * m_pad * H * F),            # 2*M*H*(2F) up+gate + 2*M*F*H out
        transcendentals=int(m_pad * F),          # sigmoid
        bytes_accessed=int(
            weight_reuse * (w_ug_t.size + b_ug.size + w_out_t.size + b_out.size)
            * w_itemsize
            + m_pad * H * x_itemsize             # x read
            + m_pad * H * out_itemsize),         # out write
    )

    if nf == 1:
        # ---- weights-resident fast path --------------------------------------
        out2d = pl.pallas_call(
            functools.partial(_swiglu_kernel_resident, tf=tf),
            out_shape=jax.ShapeDtypeStruct((m_pad, H), x.dtype),
            grid_spec=pltpu.PrefetchScalarGridSpec(
                num_scalar_prefetch=0,
                grid=(grid_m,),
                in_specs=[
                    pl.BlockSpec((tm, H), lambda i: (i, 0)),             # x tile
                    pl.BlockSpec((None, H, 2 * tf), lambda i: (0, 0, 0)),  # fused W
                    pl.BlockSpec((None, 1, 2 * tf), lambda i: (0, 0, 0)),  # fused b
                    pl.BlockSpec((tf, H), lambda i: (0, 0)),             # W_out^T
                    pl.BlockSpec((1, H), lambda i: (0, 0)),              # b_out
                ],
                out_specs=pl.BlockSpec((tm, H), lambda i: (i, 0)),
            ),
            compiler_params=pltpu.CompilerParams(
                dimension_semantics=("parallel",),
                vmem_limit_bytes=vmem_limit,
            ),
            cost_estimate=cost,
        )(x2d, w_ug_t, b_ug, w_out_t, b_out)
    else:
        # ---- F-tiled reduction path ------------------------------------------
        out2d = pl.pallas_call(
            functools.partial(_swiglu_kernel_tiled, tf=tf),
            out_shape=jax.ShapeDtypeStruct((m_pad, H), x.dtype),
            grid_spec=pltpu.PrefetchScalarGridSpec(
                num_scalar_prefetch=0,
                grid=(grid_m, nf),                                   # reduction last
                in_specs=[
                    pl.BlockSpec((tm, H), lambda i, f: (i, 0)),          # x tile
                    pl.BlockSpec((None, H, 2 * tf), lambda i, f: (f, 0, 0)),  # fused W
                    pl.BlockSpec((None, 1, 2 * tf), lambda i, f: (f, 0, 0)),  # fused b
                    pl.BlockSpec((tf, H), lambda i, f: (f, 0)),          # W_out^T
                    pl.BlockSpec((1, H), lambda i, f: (0, 0)),           # b_out
                ],
                out_specs=pl.BlockSpec((tm, H), lambda i, f: (i, 0)),
                scratch_shapes=[pltpu.VMEM((tm, H), jnp.float32)],       # f32 acc
            ),
            compiler_params=pltpu.CompilerParams(
                dimension_semantics=("parallel", "arbitrary"),
                vmem_limit_bytes=vmem_limit,
            ),
            cost_estimate=cost,
        )(x2d, w_ug_t, b_ug, w_out_t, b_out)

    return out2d[:M].reshape(orig_shape)


def _choose_tf(F, block_f):
    """Largest multiple-of-128 divisor of F that is <= block_f (fallback: F)."""
    if F <= block_f:
        return F
    t = (block_f // 128) * 128
    while t >= 128:
        if F % t == 0:
            return t
        t -= 128
    return F


def prepare_params(w_in_t, b_in, w_gate_t, b_gate, w_out_t, b_out, block_f=None):
    """Fuse up/gate projections and tile the intermediate dim for the kernel.

    Inputs are the module-shaped (pre-transposed) parameters:
      w_in_t, w_gate_t: [H, F]; b_in, b_gate: [1, F]; w_out_t: [F, H]; b_out: [1, H].
    block_f=None picks tf automatically: full-F (weights-resident, nf=1) when the
    fused weights fit the per-generation VMEM budget, else 256 on 64-MiB-VMEM
    chips (v7x) and 512 on 128-MiB chips (v5e/v6e).
    Returns kernel-layout params (do this once, outside the hot path).
    """
    H, F = w_in_t.shape
    w_itemsize = jnp.dtype(w_in_t.dtype).itemsize
    if block_f is None:
        _, budget, _ = _tpu_defaults()
        resident_bytes = 2 * (H * 2 * F + F * H) * w_itemsize   # double-buffer-safe
        if resident_bytes <= budget // 2:
            block_f = F                                          # nf = 1 fast path
        else:
            block_f = 256 if budget < (64 * 1024 * 1024) else 512
    tf = _choose_tf(F, block_f)
    nf = F // tf
    wi = w_in_t.reshape(H, nf, tf).transpose(1, 0, 2)        # [nf, H, tf]
    wg = w_gate_t.reshape(H, nf, tf).transpose(1, 0, 2)      # [nf, H, tf]
    w_ug_t = jnp.concatenate([wi, wg], axis=-1)              # [nf, H, 2*tf]
    b_ug = jnp.concatenate([b_in.reshape(nf, 1, tf),
                            b_gate.reshape(nf, 1, tf)], axis=-1)  # [nf, 1, 2*tf]
    return dict(w_ug_t=w_ug_t, b_ug=b_ug, w_out_t=w_out_t, b_out=b_out)


def init_params(key, io_features, intermediate_feature_factor, dtype=jnp.float32):
    """Synthetic init mirroring the module's parameter shapes.

    torch.nn.init.xavier_normal_ on weight [out, in]: std = sqrt(2/(fan_in+fan_out)).
    Biases are zero.  Weights returned pre-transposed to [in, out].
    """
    inter = io_features * intermediate_feature_factor
    assert float(int(inter)) == inter
    inter = int(inter)

    k1, k2, k3 = jax.random.split(key, 3)

    def xavier(k, out_f, in_f):
        std = (2.0 / (in_f + out_f)) ** 0.5
        w = jax.random.normal(k, (out_f, in_f), dtype=jnp.float32) * std
        return w.astype(dtype)

    w_in = xavier(k1, inter, io_features)       # dense_in.weight      [F, H]
    w_gate = xavier(k2, inter, io_features)     # siglu_weight.weight  [F, H]
    w_out = xavier(k3, io_features, inter)      # dense_out.weight     [H, F]

    return dict(
        w_in_t=w_in.T, b_in=jnp.zeros((1, inter), dtype),
        w_gate_t=w_gate.T, b_gate=jnp.zeros((1, inter), dtype),
        w_out_t=w_out.T, b_out=jnp.zeros((1, io_features), dtype),
    )


def _reference(x, p):
    h = x @ p["w_in_t"] + p["b_in"][0]
    g = x @ p["w_gate_t"] + p["b_gate"][0]
    a = jax.nn.silu(h) * g
    return a @ p["w_out_t"] + p["b_out"][0]


if __name__ == "__main__":
    io_features = 128                    # H (multiple of 128 -> lane-dense stores)
    intermediate_feature_factor = 4.0    # F = 512
    batch, seq = 2, 8                    # M = 16 rows

    key = jax.random.PRNGKey(0)
    kx, kp = jax.random.split(key)
    x = jax.random.normal(kx, (batch, seq, io_features), dtype=jnp.float32)
    params = init_params(kp, io_features, intermediate_feature_factor)
    ref = _reference(x, params)

    # Path 1: weights-resident fast path (auto-selected at this small size).
    fused_res = prepare_params(params["w_in_t"], params["b_in"],
                               params["w_gate_t"], params["b_gate"],
                               params["w_out_t"], params["b_out"])
    assert fused_res["w_ug_t"].shape[0] == 1, "expected nf=1 resident path"
    out = jax.block_until_ready(swiglu_mlp(x, **fused_res))
    assert out.shape == x.shape
    assert jnp.allclose(out, ref, atol=2e-5, rtol=2e-5), "resident path mismatch"

    # Path 2: F-tiled reduction path (forced tf=256 -> nf=2), f32 accumulator.
    fused_tiled = prepare_params(params["w_in_t"], params["b_in"],
                                 params["w_gate_t"], params["b_gate"],
                                 params["w_out_t"], params["b_out"], block_f=256)
    assert fused_tiled["w_ug_t"].shape[0] == 2, "expected nf=2 tiled path"
    out_t = jax.block_until_ready(swiglu_mlp(x, **fused_tiled))
    assert out_t.shape == x.shape
    assert jnp.allclose(out_t, ref, atol=2e-5, rtol=2e-5), "tiled path mismatch"

    # Path 3: bf16 weights with f32 activations — kernel casts the operands to
    # bf16 before both matmuls (MXU fast path); epilogue/accumulation stay f32.
    fused_bf16 = {k: v.astype(jnp.bfloat16) for k, v in fused_res.items()}
    out_bf16 = jax.block_until_ready(swiglu_mlp(x, **fused_bf16))
    assert out_bf16.shape == x.shape
    out_bf16_f32 = out_bf16.astype(jnp.float32)
    assert bool(jnp.isfinite(out_bf16_f32).all())
    assert float(jnp.max(jnp.abs(out_bf16_f32 - ref))) < 0.3  # loose bf16 sanity

    # TODO(synk): topology-dependent paths (tensor-parallel all-reduce,
    # sequence-parallel reduce-scatter), u-mup scaling, and FP8LinearConfig
    # quantized linears are not modeled (topology=None, _use_umup=False here).
    print("KERNEL_OK")
</pallas_src>

<mosaic_0001>
module attributes {stable_mosaic.version = 11 : i64} {
  func.func @_swiglu_kernel_resident(%arg0: i32, %arg1: memref<8x128xf32, #tpu.memory_space<vmem>>, %arg2: memref<1x128x1024xf32, #tpu.memory_space<vmem>>, %arg3: memref<1x1x1024xf32, #tpu.memory_space<vmem>>, %arg4: memref<512x128xf32, #tpu.memory_space<vmem>>, %arg5: memref<1x128xf32, #tpu.memory_space<vmem>>, %arg6: memref<8x128xf32, #tpu.memory_space<vmem>>) attributes {dimension_semantics = [#tpu.dimension_semantics<parallel>], iteration_bounds = array<i64: 2>, scalar_prefetch = 0 : i64, scratch_operands = 0 : i64, tpu.core_type = #tpu.core_type<tc>, window_params = [{transform_indices = @transform_0, window_bounds = array<i64: 8, 128>}, {pipeline_mode = #tpu.pipeline_mode<synchronous>, transform_indices = @transform_1, window_bounds = array<i64: 1, 128, 1024>}, {pipeline_mode = #tpu.pipeline_mode<synchronous>, transform_indices = @transform_2, window_bounds = array<i64: 1, 1, 1024>}, {pipeline_mode = #tpu.pipeline_mode<synchronous>, transform_indices = @transform_3, window_bounds = array<i64: 512, 128>}, {pipeline_mode = #tpu.pipeline_mode<synchronous>, transform_indices = @transform_4, window_bounds = array<i64: 1, 128>}, {transform_indices = @transform_5, window_bounds = array<i64: 8, 128>}]} {
    %c0 = arith.constant 0 : index
    %c0_0 = arith.constant 0 : index
    %0 = vector.load %arg1[%c0, %c0_0] : memref<8x128xf32, #tpu.memory_space<vmem>>, vector<8x128xf32>
    %c0_1 = arith.constant 0 : index
    %c0_2 = arith.constant 0 : index
    %c0_3 = arith.constant 0 : index
    %1 = vector.load %arg2[%c0_1, %c0_2, %c0_3] : memref<1x128x1024xf32, #tpu.memory_space<vmem>>, vector<1x128x1024xf32>
    %2 = vector.shape_cast %1 : vector<1x128x1024xf32> to vector<128x1024xf32>
    %cst = arith.constant dense<0.000000e+00> : vector<8x1024xf32>
    %3 = tpu.matmul %0, %2, %cst {dimension_numbers = #tpu.dot_dimension_numbers<[1], [0], [0], [1], [0, 0, 1, 1], [], []>} : vector<8x128xf32>, vector<128x1024xf32>, vector<8x1024xf32> -> vector<8x1024xf32>
    %c0_4 = arith.constant 0 : index
    %c0_5 = arith.constant 0 : index
    %c0_6 = arith.constant 0 : index
    %4 = vector.load %arg3[%c0_4, %c0_5, %c0_6] : memref<1x1x1024xf32, #tpu.memory_space<vmem>>, vector<1x1x1024xf32>
    %5 = vector.shape_cast %4 : vector<1x1x1024xf32> to vector<1x1024xf32>
    %6 = vector.broadcast %5 : vector<1x1024xf32> to vector<8x1024xf32>
    %7 = arith.addf %3, %6 : vector<8x1024xf32>
    %8 = vector.extract_strided_slice %7 {offsets = [0, 0], sizes = [8, 512], strides = [1, 1]} : vector<8x1024xf32> to vector<8x512xf32>
    %9 = vector.extract_strided_slice %7 {offsets = [0, 512], sizes = [8, 512], strides = [1, 1]} : vector<8x1024xf32> to vector<8x512xf32>
    %10 = arith.negf %8 : vector<8x512xf32>
    %11 = math.exp %10 : vector<8x512xf32>
    %cst_7 = arith.constant 1.000000e+00 : f32
    %12 = vector.broadcast %cst_7 : f32 to vector<8x512xf32>
    %13 = arith.addf %12, %11 : vector<8x512xf32>
    %14 = arith.divf %12, %13 : vector<8x512xf32>
    %15 = arith.mulf %8, %14 : vector<8x512xf32>
    %16 = arith.mulf %15, %9 : vector<8x512xf32>
    %c0_8 = arith.constant 0 : index
    %c0_9 = arith.constant 0 : index
    %17 = vector.load %arg4[%c0_8, %c0_9] : memref<512x128xf32, #tpu.memory_space<vmem>>, vector<512x128xf32>
    %cst_10 = arith.constant dense<0.000000e+00> : vector<8x128xf32>
    %18 = tpu.matmul %16, %17, %cst_10 {dimension_numbers = #tpu.dot_dimension_numbers<[1], [0], [0], [1], [0, 0, 1, 1], [], []>} : vector<8x512xf32>, vector<512x128xf32>, vector<8x128xf32> -> vector<8x128xf32>
    %c0_11 = arith.constant 0 : index
    %c0_12 = arith.constant 0 : index
    %19 = vector.load %arg5[%c0_11, %c0_12] : memref<1x128xf32, #tpu.memory_space<vmem>>, vector<1x128xf32>
    %20 = vector.broadcast %19 : vector<1x128xf32> to vector<8x128xf32>
    %21 = arith.addf %18, %20 : vector<8x128xf32>
    %c0_13 = arith.constant 0 : index
    %c0_14 = arith.constant 0 : index
    %22 = vector.load %arg6[%c0_13, %c0_14] : memref<8x128xf32, #tpu.memory_space<vmem>>, vector<8x128xf32>
    tpu.vector_store %arg6[%c0_13, %c0_14], %21 {strides = array<i32>} : memref<8x128xf32, #tpu.memory_space<vmem>>, vector<8x128xf32>,
    return
  }
  func.func @transform_0(%arg0: i32) -> (i32, i32) {
    %c0_i32 = arith.constant 0 : i32
    %c0_i32_0 = arith.constant 0 : i32
    return %arg0, %c0_i32 : i32, i32
  }
  func.func @transform_1(%arg0: i32) -> (i32, i32, i32) {
    %c0_i32 = arith.constant 0 : i32
    %c0_i32_0 = arith.constant 0 : i32
    %c0_i32_1 = arith.constant 0 : i32
    %c0_i32_2 = arith.constant 0 : i32
    return %c0_i32, %c0_i32_0, %c0_i32_1 : i32, i32, i32
  }
  func.func @transform_2(%arg0: i32) -> (i32, i32, i32) {
    %c0_i32 = arith.constant 0 : i32
    %c0_i32_0 = arith.constant 0 : i32
    %c0_i32_1 = arith.constant 0 : i32
    %c0_i32_2 = arith.constant 0 : i32
    return %c0_i32, %c0_i32_0, %c0_i32_1 : i32, i32, i32
  }
  func.func @transform_3(%arg0: i32) -> (i32, i32) {
    %c0_i32 = arith.constant 0 : i32
    %c0_i32_0 = arith.constant 0 : i32
    %c0_i32_1 = arith.constant 0 : i32
    return %c0_i32, %c0_i32_0 : i32, i32
  }
  func.func @transform_4(%arg0: i32) -> (i32, i32) {
    %c0_i32 = arith.constant 0 : i32
    %c0_i32_0 = arith.constant 0 : i32
    %c0_i32_1 = arith.constant 0 : i32
    return %c0_i32, %c0_i32_0 : i32, i32
  }
  func.func @transform_5(%arg0: i32) -> (i32, i32) {
    %c0_i32 = arith.constant 0 : i32
    %c0_i32_0 = arith.constant 0 : i32
    return %arg0, %c0_i32 : i32, i32
  }
}

</mosaic_0001>

<bundles_post_ra>
// kernel: swiglu_mlp.1
= control target key start
LH: loop header
LB: loop body
LE: loop exit
PB: predicated region body
PF: predicated region fallthrough
CT: control target
= control target key end

     0   :  { %10 = vsyncpa [#allocation3], 0  ;;  %s1507_s0 = inlined_call_operand.hbm [shape: f32[16,128], index: 0, kind: input, shape index: {}]   ;;  %s1508_s1 = inlined_call_operand.hbm [shape: f32[1,128,1024], index: 1, kind: input, shape index: {}]   ;;  %s1509_s2 = inlined_call_operand.hbm [shape: f32[1,1,1024], index: 2, kind: input, shape index: {}]   ;;  %s1510_s3 = inlined_call_operand.hbm [shape: f32[512,128], index: 3, kind: input, shape index: {}]   ;;  %s1511_s4 = inlined_call_operand.vmem [shape: f32[1,128], index: 4, kind: input, shape index: {}]   ;;  %s1512_s5 = inlined_call_operand.hbm [shape: f32[16,128], index: 5, kind: output, shape index: {}]  }
   0x1   :  { %12 = vsyncpa [#allocation3 + $0x1], 0 }
   0x2   :  { %13 = vsyncpa [#allocation6], 0 }
   0x3   :  { %14 = vsyncpa [#allocation9], 0 }
   0x4   :  { %15 = vsyncpa [#allocation4], 0 }
   0x5   :  { %17 = vsyncpa [#allocation4 + $0x1], 0  ;;  %s1298_s18 = smov 0   ;;  %s1300_s19 = smov 0  }
   0x6   :  { %s1302_s20 = smov 0   ;;  %s1304_s21 = smov 0  }
   0x7 LB: > { %s175_s24 = sshll.u32 %s1508_s1, 4  ;;  %s1322_s25 = sadd.s32 4294967295, %s1259_s21   ;;  %s1259_s21 = sphi %s1304_s21, %s1523_s21   ;;  %s1255_s20 = sphi %s1302_s20, %s1522_s20   ;;  %s1251_s19 = sphi %s1300_s19, %s1521_s19   ;;  %s1247_s18 = sphi %s1298_s18, %s1520_s18   ;;  %s176_s24 = int_to_ptr.hbm [resolvable:$true] %s175_s24 }
   0x8   : > { %p946_p0 = scmp.ge.s32.totalorder %s1259_s21, 1  ;;  %p44_p1 = scmp.eq.s32.totalorder %s1322_s25, 0 }
   0x9   : > { %p164_p2 = scmp.lt.s32.totalorder %s1259_s21, 3  ;;  %s1261_s27 = smov [#allocation5]  }
   0xa   : > { %s177_s28 = sshll.u32 %s1261_s27, 4  ;;  %s190_s6 = sshll.u32 %s1509_s2, 4  ;;  %s178_s28 = int_to_ptr.vmem [resolvable:$true] %s177_s28  ;;  %s191_s6 = int_to_ptr.hbm [resolvable:$true] %s190_s6 }
   0xb   : > { %p1327_p3 = pnand %p946_p0, %p164_p2  ;;  %s201_s10 = sshll.u32 %s1510_s3, 4  ;;  %s202_s10 = int_to_ptr.hbm [resolvable:$true] %s201_s10 }
   0xc   : > { %s1262_s11 = smov [#allocation7]   ;;  %s1263_s13 = smov 1024  }
   0xd   : > { %p983_p4 = pneg %p1327_p3  ;;  %s192_s12 = sshll.u32 %s1262_s11, 4  ;;  %s193_s12 = int_to_ptr.vmem [resolvable:$true] %s192_s12 }
   0xe   : > { %s1264_s14 = smov 64   ;;  %s1265_s15 = smov [#allocation8]  }
   0xf   : > { %p1339_p6 = pnand %p983_p4, %p44_p1  ;;  %s203_s16 = sshll.u32 %s1265_s15, 4  ;;  %s204_s16 = int_to_ptr.vmem [resolvable:$true] %s203_s16 }
  0x10   : > { %s1266_s17 = smov 128   ;;  %s1267_s22 = smov 8  }
  0x11   : > { %986 = dma.hbm_to_vmem [thread:$0]  (!%p1339_p6), %s176_s24, 16384, %s178_s28, [#allocation6], %s1263_s13, %s1263_s13, %s1264_s14  }
  0x12   : > { %989 = dma.hbm_to_vmem [thread:$0]  (!%p1339_p6), %s191_s6, 128, %s193_s12, [#allocation6]  }
  0x13   : > { %992 = dma.hbm_to_vmem [thread:$0]  (!%p1339_p6), %s202_s10, 8192, %s204_s16, [#allocation9], %s1266_s17, %s1266_s17, %s1267_s22  }
  0x14   : > { %s945_s23 = sadd.s32 4294967294, %s1259_s21   ;;  %s1354_s24 = sadd.s32 1, %s1259_s21  }
  0x15   : > { %s30_s27 = sadd.s32 1, %s1255_s20  ;;  %s27_s28 = ssub.s32 %s1259_s21, %s1354_s24 }
  0x16   : > { %p37_p7 = scmp.ne.s32.totalorder %s1255_s20, %s1251_s19  ;;  %p28_p8 = scmp.eq.s32.totalorder %s27_s28, 0 }
  0x17   : > { %p38_p9 = scmp.eq.s32.totalorder %s1259_s21, 0  ;;  %p43_p10 = scmp.ne.s32.totalorder %s1251_s19, %s1247_s18 }
  0x18   : > { %p151_p11 = scmp.eq.s32.totalorder %s1322_s25, 1  ;;  %p157_p0 = scmp.eq.s32.totalorder %s945_s23, 1 }
  0x19   : > { %s1366_s29 = scalar_select %p28_p8, %s1255_s20, %s30_s27  }
  0x1a   : > { %p1370_p12 = por %p44_p1, %p43_p10  ;;  %p1374_p13 = por %p151_p11, %p37_p7 }
  0x1b   : > { %p39_p2 = por %p38_p9, %p37_p7  ;;  %s220_s7 = sand.u32 1, %s1255_s20  }
  0x1c   : > { %p1379_p4 = por %p157_p0, %p43_p10  ;;  %p1004_p6 = scmp.lt.s32.totalorder %s1259_s21, 2 }
  0x1d   : > { %s951_s9 = sshll.u32 %s220_s7, 3  ;;  %s952_s10 = sshll.u32 %s1259_s21, 3 }
  0x1e   : > { %s228_s13 = scalar_lea.hbm %s1507_s0, %s952_s10  ;;  %s224_s15 = scalar_lea.vmem [#allocation2], %s951_s9 }
  0x1f   : > { %s230_s14 = sshll.u32 %s228_s13, 4  ;;  %s232_s16 = sshll.u32 %s224_s15, 4  ;;  %s231_s14 = int_to_ptr.hbm [resolvable:$true] %s230_s14  ;;  %s233_s16 = int_to_ptr.vmem [resolvable:$true] %s232_s16 }
  0x20   : > { %p1388_p8 = pnand %p1004_p6, %p39_p2  ;;  %s221_s22 = scalar_lea.sflag [#allocation3], %s220_s7 }
  0x21   : > { %s1155_s23 = sshra.s32 %s231_s14, 4  ;;  %s1162_s9 = scalar_lea.hbm %s1507_s0, 16  ;;  %s1156_s23 = int_to_ptr.hbm [resolvable:$true] %s1155_s23 }
  0x22   : > { %s1157_s27 = scalar_lea.hbm %s1156_s23, 8  ;;  %p1159_p9 = pneg %p1388_p8 }
  0x23   : > { %p1158_p7 = scmp.ne.s32.totalorder %s1156_s23, %s1157_s27  ;;  %p1163_p0 = scmp.lt.s32.totalorder %s1156_s23, %s1507_s0 }
  0x24   : > { %p1164_p2 = scmp.lt.s32.totalorder %s1162_s9, %s1157_s27 }
  0x25   : > { %p1160_p10 = pnand %p1159_p9, %p1158_p7 }
  0x26   : > { %p1165_p6 = por %p1164_p2, %p1163_p0 }
  0x27   : > { %p1161_p11 = pneg %p1160_p10 }
  0x29   : > { %p1166_p5 = pnand %p1165_p6, %p1161_p11 }
  0x2b   : > { %1169 = shalt.err (!%p1166_p5)
}
  0x2c   : > { %996 = dma.hbm_to_vmem [thread:$0]  (!%p1388_p8), %s231_s14, 128, %s233_s16, %s221_s22  }
  0x2d   : > { %241 = sbr.rel (%p1327_p3) target bundleno = 398 (0x18e), region = 40  ;;  %s1405_s7 = sand.u32 (!%p1327_p3), 1, %s1251_s19  }
  0x2e   : > { %s954_s13 = sshll.u32 (!%p1327_p3), %s1405_s7, 3  ;;  %s244_s15 = scalar_lea.sflag (!%p1327_p3), [#allocation3], %s1405_s7 }
  0x2f   : > { %s1411_s23 = scalar_lea.vmem (!%p1327_p3), [#allocation2], %s954_s13 }
  0x32   : > { %1230 = dma.done.wait (%p1370_p12), %s244_s15, 128  }
  0x33   : > { %1232 = vsyncadd (%p1370_p12), %s244_s15, 4294967168 }
  0x34   : > { %1234 = dma.done.wait (%p44_p1), [#allocation6], 16512  }
  0x35   : > { %1236 = vsyncadd (%p44_p1), [#allocation6], 4294950784 }
  0x36   : > { %1238 = dma.done.wait (%p44_p1), [#allocation9], 8192  }
  0x37   : > { %1240 = vsyncadd (%p44_p1), [#allocation9], 4294959104  ;;  %v411_v0 = vld [vmem:[#allocation5 + $0x3c0] sm:$0xff]  ;;  %v412_v1 = vld [vmem:[#allocation5 + $0x3c8] sm:$0xff]  ;;  %s964_s14 = sshll.u32 %s1322_s25, 3  ;;  %s289_s27 = scalar_lea.vmem [#allocation10], %s954_s13 }
  0x38   : > { %v413_v2 = vld [vmem:[#allocation5 + $0x3d0] sm:$0xff]  ;;  %437 = vmatpush.msra.mxu0 %v411_v0  ;;  %457 = vmatpush.msra.mxu1 %v412_v1  ;;  %v414_v3 = vld [vmem:[#allocation5 + $0x3d8] sm:$0xff]  ;;  %v403_v4 = vld [vmem:[#allocation5 + $0x380] sm:$0xff]  ;;  %s841_s22 = scalar_lea.hbm %s1512_s5, %s964_s14  ;;  %s843_s28 = sshll.u32 %s289_s27, 4  ;;  %s844_s28 = int_to_ptr.vmem [resolvable:$true] %s843_s28 }
  0x39   : > { %v404_v5 = vld [vmem:[#allocation5 + $0x388] sm:$0xff]  ;;  %477 = vmatpush.msra.mxu2 %v413_v2  ;;  %497 = vmatpush.msra.mxu3 %v414_v3  ;;  %v405_v6 = vld [vmem:[#allocation5 + $0x390] sm:$0xff]  ;;  %v406_v7 = vld [vmem:[#allocation5 + $0x398] sm:$0xff]  ;;  %s845_s10 = sshll.u32 %s841_s22, 4  ;;  %s831_s25 = scalar_lea.sflag [#allocation4], %s1405_s7  ;;  %s846_s10 = int_to_ptr.hbm [resolvable:$true] %s845_s10 }
  0x3a   : > { %v395_v8 = vld [vmem:[#allocation5 + $0x340] sm:$0xff]  ;;  %438 = vmatpush.msra.mxu0 %v403_v4  ;;  %458 = vmatpush.msra.mxu1 %v404_v5  ;;  %v396_v9 = vld [vmem:[#allocation5 + $0x348] sm:$0xff]  ;;  %v397_v10 = vld [vmem:[#allocation5 + $0x350] sm:$0xff]  ;;  %s1199_s9 = sshra.s32 %s846_s10, 4  ;;  %s1205_s13 = scalar_lea.hbm %s1512_s5, 16  ;;  %s1200_s9 = int_to_ptr.hbm [resolvable:$true] %s1199_s9 }
  0x3b   : > { %v398_v11 = vld [vmem:[#allocation5 + $0x358] sm:$0xff]  ;;  %478 = vmatpush.msra.mxu2 %v405_v6  ;;  %498 = vmatpush.msra.mxu3 %v406_v7  ;;  %v387_v12 = vld [vmem:[#allocation5 + $0x300] sm:$0xff]  ;;  %v388_v13 = vld [vmem:[#allocation5 + $0x308] sm:$0xff]  ;;  %s1201_s11 = scalar_lea.hbm %s1200_s9, 8  ;;  %p1206_p12 = scmp.lt.s32.totalorder %s1200_s9, %s1512_s5 }
  0x3c   : > { %439 = vmatpush.msra.mxu0 %v395_v8  ;;  %459 = vmatpush.msra.mxu1 %v396_v9  ;;  %v389_v14 = vld [vmem:[#allocation5 + $0x310] sm:$0xff]  ;;  %v390_v15 = vld [vmem:[#allocation5 + $0x318] sm:$0xff]  ;;  %v379_v16 = vld [vmem:[#allocation5 + $0x2c0] sm:$0xff]  ;;  %p1202_p1 = scmp.ne.s32.totalorder %s1200_s9, %s1201_s11  ;;  %p1207_p8 = scmp.lt.s32.totalorder %s1205_s13, %s1201_s11 }
  0x3d   : > { %479 = vmatpush.msra.mxu2 %v397_v10  ;;  %499 = vmatpush.msra.mxu3 %v398_v11  ;;  %v380_v17 = vld [vmem:[#allocation5 + $0x2c8] sm:$0xff]  ;;  %v381_v18 = vld [vmem:[#allocation5 + $0x2d0] sm:$0xff]  ;;  %v382_v19 = vld [vmem:[#allocation5 + $0x2d8] sm:$0xff] }
  0x3e   : > { %440 = vmatpush.msra.mxu0 %v387_v12  ;;  %460 = vmatpush.msra.mxu1 %v388_v13  ;;  %v371_v20 = vld [vmem:[#allocation5 + $0x280] sm:$0xff]  ;;  %v372_v21 = vld [vmem:[#allocation5 + $0x288] sm:$0xff]  ;;  %v373_v22 = vld [vmem:[#allocation5 + $0x290] sm:$0xff]  ;;  %p1203_p3 = pnand %p1202_p1, %p1374_p13  ;;  %p1208_p7 = por %p1207_p8, %p1206_p12 }
  0x3f   : > { %480 = vmatpush.msra.mxu2 %v389_v14  ;;  %500 = vmatpush.msra.mxu3 %v390_v15  ;;  %v374_v23 = vld [vmem:[#allocation5 + $0x298] sm:$0xff]  ;;  %v363_v24 = vld [vmem:[#allocation5 + $0x240] sm:$0xff]  ;;  %v364_v25 = vld [vmem:[#allocation5 + $0x248] sm:$0xff] }
  0x40   : > { %441 = vmatpush.msra.mxu0 %v379_v16  ;;  %461 = vmatpush.msra.mxu1 %v380_v17  ;;  %v365_v26 = vld [vmem:[#allocation5 + $0x250] sm:$0xff]  ;;  %v366_v27 = vld [vmem:[#allocation5 + $0x258] sm:$0xff]  ;;  %v355_v28 = vld [vmem:[#allocation5 + $0x200] sm:$0xff]  ;;  %p1204_p5 = pneg %p1203_p3 }
  0x41   : > { %481 = vmatpush.msra.mxu2 %v381_v18  ;;  %501 = vmatpush.msra.mxu3 %v382_v19  ;;  %v356_v29 = vld [vmem:[#allocation5 + $0x208] sm:$0xff]  ;;  %v357_v30 = vld [vmem:[#allocation5 + $0x210] sm:$0xff]  ;;  %v358_v31 = vld [vmem:[#allocation5 + $0x218] sm:$0xff] }
  0x42   : > { %442 = vmatpush.msra.mxu0 %v371_v20  ;;  %462 = vmatpush.msra.mxu1 %v372_v21  ;;  %v347_v32 = vld [vmem:[#allocation5 + $0x1c0] sm:$0xff]  ;;  %v348_v33 = vld [vmem:[#allocation5 + $0x1c8] sm:$0xff]  ;;  %v349_v34 = vld [vmem:[#allocation5 + $0x1d0] sm:$0xff]  ;;  %p1209_p9 = pnand %p1208_p7, %p1204_p5 }
  0x43   : > { %482 = vmatpush.msra.mxu2 %v373_v22  ;;  %502 = vmatpush.msra.mxu3 %v374_v23  ;;  %v350_v35 = vld [vmem:[#allocation5 + $0x1d8] sm:$0xff]  ;;  %v339_v36 = vld [vmem:[#allocation5 + $0x180] sm:$0xff]  ;;  %v340_v37 = vld [vmem:[#allocation5 + $0x188] sm:$0xff] }
  0x44   : > { %443 = vmatpush.msra.mxu0 %v363_v24  ;;  %463 = vmatpush.msra.mxu1 %v364_v25  ;;  %v341_v38 = vld [vmem:[#allocation5 + $0x190] sm:$0xff]  ;;  %v342_v39 = vld [vmem:[#allocation5 + $0x198] sm:$0xff]  ;;  %v331_v40 = vld [vmem:[#allocation5 + $0x140] sm:$0xff] }
  0x45   : > { %483 = vmatpush.msra.mxu2 %v365_v26  ;;  %503 = vmatpush.msra.mxu3 %v366_v27  ;;  %v332_v41 = vld [vmem:[#allocation5 + $0x148] sm:$0xff]  ;;  %v333_v42 = vld [vmem:[#allocation5 + $0x150] sm:$0xff]  ;;  %v334_v43 = vld [vmem:[#allocation5 + $0x158] sm:$0xff] }
  0x46   : > { %444 = vmatpush.msra.mxu0 %v355_v28  ;;  %464 = vmatpush.msra.mxu1 %v356_v29  ;;  %v323_v44 = vld [vmem:[#allocation5 + $0x100] sm:$0xff]  ;;  %v324_v45 = vld [vmem:[#allocation5 + $0x108] sm:$0xff]  ;;  %v325_v46 = vld [vmem:[#allocation5 + $0x110] sm:$0xff] }
  0x47   : > { %484 = vmatpush.msra.mxu2 %v357_v30  ;;  %504 = vmatpush.msra.mxu3 %v358_v31  ;;  %v326_v47 = vld [vmem:[#allocation5 + $0x118] sm:$0xff]  ;;  %v315_v48 = vld [vmem:[#allocation5 + $0xc0] sm:$0xff]  ;;  %v316_v49 = vld [vmem:[#allocation5 + $0xc8] sm:$0xff] }
  0x48   : > { %445 = vmatpush.msra.mxu0 %v347_v32  ;;  %465 = vmatpush.msra.mxu1 %v348_v33  ;;  %v317_v50 = vld [vmem:[#allocation5 + $0xd0] sm:$0xff]  ;;  %v318_v51 = vld [vmem:[#allocation5 + $0xd8] sm:$0xff]  ;;  %v307_v52 = vld [vmem:[#allocation5 + $0x80] sm:$0xff] }
  0x49   : > { %485 = vmatpush.msra.mxu2 %v349_v34  ;;  %505 = vmatpush.msra.mxu3 %v350_v35  ;;  %v308_v53 = vld [vmem:[#allocation5 + $0x88] sm:$0xff]  ;;  %v309_v54 = vld [vmem:[#allocation5 + $0x90] sm:$0xff]  ;;  %v310_v55 = vld [vmem:[#allocation5 + $0x98] sm:$0xff] }
  0x4a   : > { %446 = vmatpush.msra.mxu0 %v339_v36  ;;  %466 = vmatpush.msra.mxu1 %v340_v37  ;;  %v299_v56 = vld [vmem:[#allocation5 + $0x40] sm:$0xff]  ;;  %v300_v57 = vld [vmem:[#allocation5 + $0x48] sm:$0xff]  ;;  %v301_v58 = vld [vmem:[#allocation5 + $0x50] sm:$0xff] }
  0x4b   : > { %486 = vmatpush.msra.mxu2 %v341_v38  ;;  %506 = vmatpush.msra.mxu3 %v342_v39  ;;  %v302_v59 = vld [vmem:[#allocation5 + $0x58] sm:$0xff]  ;;  %v291_v60 = vld [vmem:[#allocation5] sm:$0xff]  ;;  %v292_v61 = vld [vmem:[#allocation5 + $0x8] sm:$0xff] }
  0x4c   : > { %447 = vmatpush.msra.mxu0 %v331_v40  ;;  %467 = vmatpush.msra.mxu1 %v332_v41  ;;  %v293_v62 = vld [vmem:[#allocation5 + $0x10] sm:$0xff]  ;;  %v294_v63 = vld [vmem:[#allocation5 + $0x18] sm:$0xff]  ;;  %v415_v1 = vld [vmem:[#allocation5 + $0x3e0] sm:$0xff] }
  0x4d   : > { %487 = vmatpush.msra.mxu2 %v333_v42  ;;  %507 = vmatpush.msra.mxu3 %v334_v43  ;;  %v1426_v0 = vld [vmem:[%s1411_s23] sm:$0xff]  ;;  %v416_v2 = vld [vmem:[#allocation5 + $0x3e8] sm:$0xff]  ;;  %v407_v5 = vld [vmem:[#allocation5 + $0x3a0] sm:$0xff] }
  0x4e   : > { %448 = vmatpush.msra.mxu0 %v323_v44  ;;  %468 = vmatpush.msra.mxu1 %v324_v45  ;;  %v417_v3 = vld [vmem:[#allocation5 + $0x3f0] sm:$0xff]  ;;  %v418_v4 = vld [vmem:[#allocation5 + $0x3f8] sm:$0xff]  ;;  %v408_v6 = vld [vmem:[#allocation5 + $0x3a8] sm:$0xff] }
  0x4f   : > { %488 = vmatpush.msra.mxu2 %v325_v46  ;;  %508 = vmatpush.msra.mxu3 %v326_v47  ;;  %v409_v7 = vld [vmem:[#allocation5 + $0x3b0] sm:$0xff]  ;;  %v410_v8 = vld [vmem:[#allocation5 + $0x3b8] sm:$0xff]  ;;  %v399_v9 = vld [vmem:[#allocation5 + $0x360] sm:$0xff] }
  0x50   : > { %449 = vmatpush.msra.mxu0 %v315_v48  ;;  %469 = vmatpush.msra.mxu1 %v316_v49  ;;  %v400_v10 = vld [vmem:[#allocation5 + $0x368] sm:$0xff]  ;;  %v401_v11 = vld [vmem:[#allocation5 + $0x370] sm:$0xff]  ;;  %v402_v12 = vld [vmem:[#allocation5 + $0x378] sm:$0xff] }
  0x51   : > { %489 = vmatpush.msra.mxu2 %v317_v50  ;;  %509 = vmatpush.msra.mxu3 %v318_v51  ;;  %v391_v13 = vld [vmem:[#allocation5 + $0x320] sm:$0xff]  ;;  %v392_v14 = vld [vmem:[#allocation5 + $0x328] sm:$0xff]  ;;  %v393_v15 = vld [vmem:[#allocation5 + $0x330] sm:$0xff] }
  0x52   : > { %450 = vmatpush.msra.mxu0 %v307_v52  ;;  %470 = vmatpush.msra.mxu1 %v308_v53  ;;  %v394_v16 = vld [vmem:[#allocation5 + $0x338] sm:$0xff]  ;;  %v383_v17 = vld [vmem:[#allocation5 + $0x2e0] sm:$0xff]  ;;  %v384_v18 = vld [vmem:[#allocation5 + $0x2e8] sm:$0xff] }
  0x53   : > { %490 = vmatpush.msra.mxu2 %v309_v54  ;;  %510 = vmatpush.msra.mxu3 %v310_v55  ;;  %v385_v19 = vld [vmem:[#allocation5 + $0x2f0] sm:$0xff]  ;;  %v386_v20 = vld [vmem:[#allocation5 + $0x2f8] sm:$0xff]  ;;  %v375_v21 = vld [vmem:[#allocation5 + $0x2a0] sm:$0xff] }
  0x54   : > { %451 = vmatpush.msra.mxu0 %v299_v56  ;;  %471 = vmatpush.msra.mxu1 %v300_v57  ;;  %v376_v22 = vld [vmem:[#allocation5 + $0x2a8] sm:$0xff]  ;;  %v377_v23 = vld [vmem:[#allocation5 + $0x2b0] sm:$0xff]  ;;  %v378_v24 = vld [vmem:[#allocation5 + $0x2b8] sm:$0xff] }
  0x55   : > { %491 = vmatpush.msra.mxu2 %v301_v58  ;;  %511 = vmatpush.msra.mxu3 %v302_v59  ;;  %v367_v25 = vld [vmem:[#allocation5 + $0x260] sm:$0xff]  ;;  %v368_v26 = vld [vmem:[#allocation5 + $0x268] sm:$0xff]  ;;  %v369_v27 = vld [vmem:[#allocation5 + $0x270] sm:$0xff] }
  0x56   : > { %452 = vmatpush.msra.mxu0 %v291_v60  ;;  %472 = vmatpush.msra.mxu1 %v292_v61  ;;  %v370_v28 = vld [vmem:[#allocation5 + $0x278] sm:$0xff]  ;;  %v359_v29 = vld [vmem:[#allocation5 + $0x220] sm:$0xff]  ;;  %v360_v30 = vld [vmem:[#allocation5 + $0x228] sm:$0xff] }
  0x57   : > { %492 = vmatpush.msra.mxu2 %v293_v62  ;;  %512 = vmatpush.msra.mxu3 %v294_v63  ;;  %v361_v31 = vld [vmem:[#allocation5 + $0x230] sm:$0xff]  ;;  %v362_v32 = vld [vmem:[#allocation5 + $0x238] sm:$0xff]  ;;  %v351_v33 = vld [vmem:[#allocation5 + $0x1e0] sm:$0xff] }
  0x58   : > { %453 = vmatmul.f32.vlgmr.msra.gmra.mxu0 %v1426_v0  ;;  %473 = vmatmul.f32.vlgmr.msra.gmra.mxu1 %v1426_v0  ;;  %v352_v34 = vld [vmem:[#allocation5 + $0x1e8] sm:$0xff]  ;;  %v353_v35 = vld [vmem:[#allocation5 + $0x1f0] sm:$0xff]  ;;  %v354_v36 = vld [vmem:[#allocation5 + $0x1f8] sm:$0xff] }
  0x59   : > { %493 = vmatmul.f32.vlgmr.msra.gmra.mxu2 %v1426_v0  ;;  %513 = vmatmul.f32.vlgmr.msra.gmra.mxu3 %v1426_v0  ;;  %v343_v37 = vld [vmem:[#allocation5 + $0x1a0] sm:$0xff]  ;;  %v344_v38 = vld [vmem:[#allocation5 + $0x1a8] sm:$0xff]  ;;  %v345_v39 = vld [vmem:[#allocation5 + $0x1b0] sm:$0xff] }
  0x5a   : > { %517 = vmatpush.msrb.mxu0 %v415_v1  ;;  %537 = vmatpush.msrb.mxu1 %v416_v2  ;;  %v346_v40 = vld [vmem:[#allocation5 + $0x1b8] sm:$0xff]  ;;  %v335_v41 = vld [vmem:[#allocation5 + $0x160] sm:$0xff]  ;;  %v336_v42 = vld [vmem:[#allocation5 + $0x168] sm:$0xff] }
  0x5b   : > { %557 = vmatpush.msrb.mxu2 %v417_v3  ;;  %577 = vmatpush.msrb.mxu3 %v418_v4  ;;  %v337_v43 = vld [vmem:[#allocation5 + $0x170] sm:$0xff]  ;;  %v338_v44 = vld [vmem:[#allocation5 + $0x178] sm:$0xff]  ;;  %v327_v45 = vld [vmem:[#allocation5 + $0x120] sm:$0xff] }
  0x5c   : > { %518 = vmatpush.msrb.mxu0 %v407_v5  ;;  %538 = vmatpush.msrb.mxu1 %v408_v6  ;;  %v328_v46 = vld [vmem:[#allocation5 + $0x128] sm:$0xff]  ;;  %v329_v47 = vld [vmem:[#allocation5 + $0x130] sm:$0xff]  ;;  %v330_v48 = vld [vmem:[#allocation5 + $0x138] sm:$0xff] }
  0x5d   : > { %558 = vmatpush.msrb.mxu2 %v409_v7  ;;  %578 = vmatpush.msrb.mxu3 %v410_v8  ;;  %v319_v49 = vld [vmem:[#allocation5 + $0xe0] sm:$0xff]  ;;  %v320_v50 = vld [vmem:[#allocation5 + $0xe8] sm:$0xff]  ;;  %v321_v51 = vld [vmem:[#allocation5 + $0xf0] sm:$0xff] }
  0x5e   : > { %519 = vmatpush.msrb.mxu0 %v399_v9  ;;  %539 = vmatpush.msrb.mxu1 %v400_v10  ;;  %v322_v52 = vld [vmem:[#allocation5 + $0xf8] sm:$0xff]  ;;  %v311_v53 = vld [vmem:[#allocation5 + $0xa0] sm:$0xff]  ;;  %v312_v54 = vld [vmem:[#allocation5 + $0xa8] sm:$0xff] }
  0x5f   : > { %559 = vmatpush.msrb.mxu2 %v401_v11  ;;  %579 = vmatpush.msrb.mxu3 %v402_v12  ;;  %v313_v55 = vld [vmem:[#allocation5 + $0xb0] sm:$0xff]  ;;  %v314_v56 = vld [vmem:[#allocation5 + $0xb8] sm:$0xff]  ;;  %v303_v57 = vld [vmem:[#allocation5 + $0x60] sm:$0xff] }
  0x60   : > { %520 = vmatpush.msrb.mxu0 %v391_v13  ;;  %540 = vmatpush.msrb.mxu1 %v392_v14  ;;  %v304_v58 = vld [vmem:[#allocation5 + $0x68] sm:$0xff]  ;;  %v305_v59 = vld [vmem:[#allocation5 + $0x70] sm:$0xff]  ;;  %v306_v60 = vld [vmem:[#allocation5 + $0x78] sm:$0xff] }
  0x61   : > { %560 = vmatpush.msrb.mxu2 %v393_v15  ;;  %580 = vmatpush.msrb.mxu3 %v394_v16  ;;  %v295_v61 = vld [vmem:[#allocation5 + $0x20] sm:$0xff]  ;;  %v296_v62 = vld [vmem:[#allocation5 + $0x28] sm:$0xff]  ;;  %v297_v63 = vld [vmem:[#allocation5 + $0x30] sm:$0xff] }
  0x62   : > { %521 = vmatpush.msrb.mxu0 %v383_v17  ;;  %541 = vmatpush.msrb.mxu1 %v384_v18  ;;  %v298_v1 = vld [vmem:[#allocation5 + $0x38] sm:$0xff]  ;;  %v696_v2 = vld [vmem:[#allocation8 + $0x78] sm:$0xff]  ;;  %v694_v6 = vld [vmem:[#allocation8 + $0x68] sm:$0xff] }
  0x63   : > { %561 = vmatpush.msrb.mxu2 %v385_v19  ;;  %581 = vmatpush.msrb.mxu3 %v386_v20  ;;  %v712_v3 = vld [vmem:[#allocation8 + $0xf8] sm:$0xff]  ;;  %v695_v4 = vld [vmem:[#allocation8 + $0x70] sm:$0xff]  ;;  %v710_v7 = vld [vmem:[#allocation8 + $0xe8] sm:$0xff] }
  0x64   : > { %522 = vmatpush.msrb.mxu0 %v375_v21  ;;  %542 = vmatpush.msrb.mxu1 %v376_v22  ;;  %v711_v5 = vld [vmem:[#allocation8 + $0xf0] sm:$0xff]  ;;  %v693_v8 = vld [vmem:[#allocation8 + $0x60] sm:$0xff]  ;;  %v728_v10 = vld [vmem:[#allocation8 + $0x178] sm:$0xff] }
  0x65   : > { %562 = vmatpush.msrb.mxu2 %v377_v23  ;;  %582 = vmatpush.msrb.mxu3 %v378_v24  ;;  %v709_v9 = vld [vmem:[#allocation8 + $0xe0] sm:$0xff]  ;;  %v744_v11 = vld [vmem:[#allocation8 + $0x1f8] sm:$0xff]  ;;  %v727_v13 = vld [vmem:[#allocation8 + $0x170] sm:$0xff] }
  0x66   : > { %523 = vmatpush.msrb.mxu0 %v367_v25  ;;  %543 = vmatpush.msrb.mxu1 %v368_v26  ;;  %v708_v12 = vld [vmem:[#allocation8 + $0xd8] sm:$0xff]  ;;  %v743_v14 = vld [vmem:[#allocation8 + $0x1f0] sm:$0xff]  ;;  %v726_v17 = vld [vmem:[#allocation8 + $0x168] sm:$0xff] }
  0x67   : > { %563 = vmatpush.msrb.mxu2 %v369_v27  ;;  %583 = vmatpush.msrb.mxu3 %v370_v28  ;;  %v691_v15 = vld [vmem:[#allocation8 + $0x50] sm:$0xff]  ;;  %v742_v18 = vld [vmem:[#allocation8 + $0x1e8] sm:$0xff]  ;;  %v725_v21 = vld [vmem:[#allocation8 + $0x160] sm:$0xff] }
  0x68   : > { %524 = vmatpush.msrb.mxu0 %v359_v29  ;;  %544 = vmatpush.msrb.mxu1 %v360_v30  ;;  %v707_v16 = vld [vmem:[#allocation8 + $0xd0] sm:$0xff]  ;;  %v690_v19 = vld [vmem:[#allocation8 + $0x48] sm:$0xff]  ;;  %v741_v22 = vld [vmem:[#allocation8 + $0x1e0] sm:$0xff] }
  0x69   : > { %564 = vmatpush.msrb.mxu2 %v361_v31  ;;  %584 = vmatpush.msrb.mxu3 %v362_v32  ;;  %v706_v20 = vld [vmem:[#allocation8 + $0xc8] sm:$0xff]  ;;  %v689_v23 = vld [vmem:[#allocation8 + $0x40] sm:$0xff]  ;;  %v724_v25 = vld [vmem:[#allocation8 + $0x158] sm:$0xff] }
  0x6a   : > { %525 = vmatpush.msrb.mxu0 %v351_v33  ;;  %545 = vmatpush.msrb.mxu1 %v352_v34  ;;  %v705_v24 = vld [vmem:[#allocation8 + $0xc0] sm:$0xff]  ;;  %v740_v26 = vld [vmem:[#allocation8 + $0x1d8] sm:$0xff]  ;;  %v723_v29 = vld [vmem:[#allocation8 + $0x150] sm:$0xff] }
  0x6b   : > { %565 = vmatpush.msrb.mxu2 %v353_v35  ;;  %585 = vmatpush.msrb.mxu3 %v354_v36  ;;  %v688_v27 = vld [vmem:[#allocation8 + $0x38] sm:$0xff]  ;;  %v739_v31 = vld [vmem:[#allocation8 + $0x1d0] sm:$0xff]  ;;  %v722_v34 = vld [vmem:[#allocation8 + $0x148] sm:$0xff] }
  0x6c   : > { %526 = vmatpush.msrb.mxu0 %v343_v37  ;;  %546 = vmatpush.msrb.mxu1 %v344_v38  ;;  %v704_v28 = vld [vmem:[#allocation8 + $0xb8] sm:$0xff]  ;;  %v687_v32 = vld [vmem:[#allocation8 + $0x30] sm:$0xff]  ;;  %v738_v35 = vld [vmem:[#allocation8 + $0x1c8] sm:$0xff] }
  0x6d   : > { %566 = vmatpush.msrb.mxu2 %v345_v39  ;;  %586 = vmatpush.msrb.mxu3 %v346_v40  ;;  %v1436_v30 = vld [vmem:[#allocation7] sm:$0xff]  ;;  %v703_v33 = vld [vmem:[#allocation8 + $0xb0] sm:$0xff]  ;;  %v686_v36 = vld [vmem:[#allocation8 + $0x28] sm:$0xff] }
  0x6e   : > { %527 = vmatpush.msrb.mxu0 %v335_v41  ;;  %547 = vmatpush.msrb.mxu1 %v336_v42  ;;  %v702_v37 = vld [vmem:[#allocation8 + $0xa8] sm:$0xff]  ;;  %v721_v38 = vld [vmem:[#allocation8 + $0x140] sm:$0xff]  ;;  %v421_v39 = vperm.slane %v1436_v30, 0  ;;  %v422_v40 = vperm.slane %v1436_v30, 1 }
  0x6f   : > { %567 = vmatpush.msrb.mxu2 %v337_v43  ;;  %587 = vmatpush.msrb.mxu3 %v338_v44  ;;  %v737_v41 = vld [vmem:[#allocation8 + $0x1c0] sm:$0xff]  ;;  %v720_v44 = vld [vmem:[#allocation8 + $0x138] sm:$0xff] }
  0x70   : > { %528 = vmatpush.msrb.mxu0 %v327_v45  ;;  %548 = vmatpush.msrb.mxu1 %v328_v46  ;;  %v685_v42 = vld [vmem:[#allocation8 + $0x20] sm:$0xff]  ;;  %v736_v45 = vld [vmem:[#allocation8 + $0x1b8] sm:$0xff] }
  0x71   : > { %568 = vmatpush.msrb.mxu2 %v329_v47  ;;  %588 = vmatpush.msrb.mxu3 %v330_v48  ;;  %v701_v43 = vld [vmem:[#allocation8 + $0xa0] sm:$0xff]  ;;  %v684_v48 = vld [vmem:[#allocation8 + $0x18] sm:$0xff] }
  0x72   : > { %529 = vmatpush.msrb.mxu0 %v319_v49  ;;  %549 = vmatpush.msrb.mxu1 %v320_v50  ;;  %v700_v49 = vld [vmem:[#allocation8 + $0x98] sm:$0xff]  ;;  %v719_v50 = vld [vmem:[#allocation8 + $0x130] sm:$0xff] }
  0x73   : > { %569 = vmatpush.msrb.mxu2 %v321_v51  ;;  %589 = vmatpush.msrb.mxu3 %v322_v52 }
  0x74   : > { %530 = vmatpush.msrb.mxu0 %v311_v53  ;;  %550 = vmatpush.msrb.mxu1 %v312_v54  ;;  %v735_v53 = vld [vmem:[#allocation8 + $0x1b0] sm:$0xff] }
  0x75   : > { %570 = vmatpush.msrb.mxu2 %v313_v55  ;;  %590 = vmatpush.msrb.mxu3 %v314_v56  ;;  %v683_v54 = vld [vmem:[#allocation8 + $0x10] sm:$0xff]  ;;  %v718_v56 = vld [vmem:[#allocation8 + $0x128] sm:$0xff] }
  0x76   : > { %531 = vmatpush.msrb.mxu0 %v303_v57  ;;  %551 = vmatpush.msrb.mxu1 %v304_v58  ;;  %v699_v55 = vld [vmem:[#allocation8 + $0x90] sm:$0xff] }
  0x77   : > { %571 = vmatpush.msrb.mxu2 %v305_v59  ;;  %591 = vmatpush.msrb.mxu3 %v306_v60  ;;  %v734_v59 = vld [vmem:[#allocation8 + $0x1a8] sm:$0xff]  ;;  %v423_v60 = vperm.slane %v1436_v30, 2 }
  0x78   : > { %532 = vmatpush.msrb.mxu0 %v295_v61  ;;  %552 = vmatpush.msrb.mxu1 %v296_v62  ;;  %v424_v61 = vperm.slane %v1436_v30, 3  ;;  %v682_v62 = vld [vmem:[#allocation8 + $0x8] sm:$0xff] }
  0x79   : > { %572 = vmatpush.msrb.mxu2 %v297_v63  ;;  %592 = vmatpush.msrb.mxu3 %v298_v1  ;;  %v698_v63 = vld [vmem:[#allocation8 + $0x88] sm:$0xff]  ;;  %v717_v1 = vld [vmem:[#allocation8 + $0x120] sm:$0xff] }
  0x7a   : > { %533 = vmatmul.f32.vlgmr.msrb.gmra.mxu0 %v1426_v0  ;;  %553 = vmatmul.f32.vlgmr.msrb.gmra.mxu1 %v1426_v0 }
  0x7b   : > { %573 = vmatmul.f32.vlgmr.msrb.gmra.mxu2 %v1426_v0  ;;  %593 = vmatmul.f32.vlgmr.msrb.gmra.mxu3 %v1426_v0  ;;  %v692_v0 = vld [vmem:[#allocation8 + $0x58] sm:$0xff] }
  0x7c   : > { %749 = vmatpush.msra.mxu0 %v696_v2  ;;  %769 = vmatpush.msra.mxu1 %v712_v3  ;;  %v733_v2 = vld [vmem:[#allocation8 + $0x1a0] sm:$0xff] }
  0x7d   : > { %789 = vmatpush.msra.mxu2 %v728_v10  ;;  %809 = vmatpush.msra.mxu3 %v744_v11  ;;  %v681_v3 = vld [vmem:[#allocation8] sm:$0xff]  ;;  %v715_v11 = vld [vmem:[#allocation8 + $0x110] sm:$0xff] }
  0x7e   : > { %750 = vmatpush.msra.mxu0 %v695_v4  ;;  %770 = vmatpush.msra.mxu1 %v711_v5  ;;  %v697_v4 = vld [vmem:[#allocation8 + $0x80] sm:$0xff]  ;;  %v716_v5 = vld [vmem:[#allocation8 + $0x118] sm:$0xff] }
  0x7f   : > { %790 = vmatpush.msra.mxu2 %v727_v13  ;;  %810 = vmatpush.msra.mxu3 %v743_v14  ;;  %v714_v14 = vld [vmem:[#allocation8 + $0x108] sm:$0xff] }
  0x80   : > { %751 = vmatpush.msra.mxu0 %v694_v6  ;;  %771 = vmatpush.msra.mxu1 %v710_v7 }
  0x81   : > { %791 = vmatpush.msra.mxu2 %v726_v17  ;;  %811 = vmatpush.msra.mxu3 %v742_v18 }
  0x82   : > { %752 = vmatpush.msra.mxu0 %v693_v8  ;;  %772 = vmatpush.msra.mxu1 %v709_v9  ;;  %v732_v8 = vld [vmem:[#allocation8 + $0x198] sm:$0xff] }
  0x83   : > { %792 = vmatpush.msra.mxu2 %v725_v21  ;;  %812 = vmatpush.msra.mxu3 %v741_v22 }
  0x84   : > { %753 = vmatpush.msra.mxu0 %v692_v0  ;;  %773 = vmatpush.msra.mxu1 %v708_v12  ;;  %v731_v0 = vld [vmem:[#allocation8 + $0x190] sm:$0xff] }
  0x85   : > { %793 = vmatpush.msra.mxu2 %v724_v25  ;;  %813 = vmatpush.msra.mxu3 %v740_v26 }
  0x86   : > { %754 = vmatpush.msra.mxu0 %v691_v15  ;;  %774 = vmatpush.msra.mxu1 %v707_v16  ;;  %v730_v15 = vld [vmem:[#allocation8 + $0x188] sm:$0xff] }
  0x87   : > { %794 = vmatpush.msra.mxu2 %v723_v29  ;;  %814 = vmatpush.msra.mxu3 %v739_v31 }
  0x88   : > { %755 = vmatpush.msra.mxu0 %v690_v19  ;;  %775 = vmatpush.msra.mxu1 %v706_v20  ;;  %v713_v19 = vld [vmem:[#allocation8 + $0x100] sm:$0xff] }
  0x89   : > { %795 = vmatpush.msra.mxu2 %v722_v34  ;;  %815 = vmatpush.msra.mxu3 %v738_v35  ;;  %v729_v20 = vld [vmem:[#allocation8 + $0x180] sm:$0xff] }
  0x8a   : > { %756 = vmatpush.msra.mxu0 %v689_v23  ;;  %776 = vmatpush.msra.mxu1 %v705_v24 }
  0x8b   : > { %796 = vmatpush.msra.mxu2 %v721_v38  ;;  %816 = vmatpush.msra.mxu3 %v737_v41 }
  0x8c   : > { %757 = vmatpush.msra.mxu0 %v688_v27  ;;  %777 = vmatpush.msra.mxu1 %v704_v28 }
  0x8d   : > { %797 = vmatpush.msra.mxu2 %v720_v44  ;;  %817 = vmatpush.msra.mxu3 %v736_v45 }
  0x8e   : > { %758 = vmatpush.msra.mxu0 %v687_v32  ;;  %778 = vmatpush.msra.mxu1 %v703_v33 }
  0x8f   : > { %798 = vmatpush.msra.mxu2 %v719_v50  ;;  %818 = vmatpush.msra.mxu3 %v735_v53 }
  0x90   : > { %759 = vmatpush.msra.mxu0 %v686_v36  ;;  %779 = vmatpush.msra.mxu1 %v702_v37 }
  0x91   : > { %799 = vmatpush.msra.mxu2 %v718_v56  ;;  %819 = vmatpush.msra.mxu3 %v734_v59  ;;  %v426_v56 = vperm.slane %v1436_v30, 5 }
  0x92   : > { %760 = vmatpush.msra.mxu0 %v685_v42  ;;  %780 = vmatpush.msra.mxu1 %v701_v43 }
  0x93   : > { %800 = vmatpush.msra.mxu2 %v717_v1  ;;  %820 = vmatpush.msra.mxu3 %v733_v2 }
  0x94   : > { %761 = vmatpush.msra.mxu0 %v684_v48  ;;  %781 = vmatpush.msra.mxu1 %v700_v49 }
  0x95   : > { %801 = vmatpush.msra.mxu2 %v716_v5  ;;  %821 = vmatpush.msra.mxu3 %v732_v8 }
  0x96   : > { %762 = vmatpush.msra.mxu0 %v683_v54  ;;  %782 = vmatpush.msra.mxu1 %v699_v55  ;;  %v425_v55 = vperm.slane %v1436_v30, 4 }
  0x97   : > { %802 = vmatpush.msra.mxu2 %v715_v11  ;;  %822 = vmatpush.msra.mxu3 %v731_v0 }
  0x98   : > { %763 = vmatpush.msra.mxu0 %v682_v62  ;;  %783 = vmatpush.msra.mxu1 %v698_v63 }
  0x99   : > { %803 = vmatpush.msra.mxu2 %v714_v14  ;;  %823 = vmatpush.msra.mxu3 %v730_v15  ;;  %v427_v14 = vperm.slane %v1436_v30, 6  ;;  %v428_v15 = vperm.slane %v1436_v30, 7  ;;  %v1048_v30 = vld [vmem:[%s1511_s4] ss:$0 sm:$0xff] }
  0x9a   : > { %764 = vmatpush.msra.mxu0 %v681_v3  ;;  %784 = vmatpush.msra.mxu1 %v697_v4 }
  0x9b   : > { %804 = vmatpush.msra.mxu2 %v713_v19  ;;  %824 = vmatpush.msra.mxu3 %v729_v20 }
  0xd5   : > { %v454_v46 = vpop.f32.mrf.mxu0  ;;  %v474_v47 = vpop.f32.mrf.mxu1 }
  0xd6   : > { %v1440_v51 = vadd.f32 %v454_v46, %v421_v39  ;;  %v1442_v52 = vadd.f32 %v474_v47, %v422_v40 }
  0xd8   : > { %v959_v57 = vmul.f32 -1.442695, %v1440_v51  ;;  %v960_v58 = vmul.f32 -1.442695, %v1442_v52 }
  0xda   : > { %1049 = vpow2.f32 %v959_v57 }
  0xdb   : > { %1051 = vpow2.f32 %v960_v58 }
  0xdc   : > { %v494_v6 = vpop.f32.mrf.mxu2  ;;  %v514_v7 = vpop.f32.mrf.mxu3 }
  0xdd   : > { %v1448_v9 = vadd.f32 %v494_v6, %v423_v60  ;;  %v1450_v10 = vadd.f32 %v514_v7, %v424_v61 }
  0xdf   : > { %v961_v12 = vmul.f32 -1.442695, %v1448_v9  ;;  %v962_v13 = vmul.f32 -1.442695, %v1450_v10 }
  0xe0   : > { %v1050_v16 = vpop.eup %1049 }
  0xe1   : > { %v1052_v17 = vpop.eup %1051  ;;  %v609_v18 = vadd.f32 1.0, %v1050_v16  ;;  %1053 = vpow2.f32 %v961_v12 }
  0xe2   : > { %v610_v21 = vadd.f32 1.0, %v1052_v17  ;;  %1055 = vpow2.f32 %v962_v13 }
  0xe3   : > { %1057 = vrcp.f32 %v609_v18  ;;  %vm618_vm0 = vweird.f32 %v609_v18  ;;  %v624_v33 = vand.u32 2147483648, %v609_v18  ;;  %v622_v36 = vand.u32 2147483647, %v609_v18 }
  0xe4   : > { %1059 = vrcp.f32 %v610_v21  ;;  %v639_v32 = vand.u32 2147483648, %v610_v21  ;;  %v637_v37 = vand.u32 2147483647, %v610_v21  ;;  %vm633_vm2 = vweird.f32 %v610_v21 }
  0xe5   : > { %v625_v42 = vor.u32 1.1754944e-38, %v624_v33  ;;  %vm623_vm5 = vcmp.eq.f32.partialorder %v622_v36, 8.507059e+37 }
  0xe6   : > { %v640_v41 = vor.u32 1.1754944e-38, %v639_v32  ;;  %vm638_vm7 = vcmp.eq.f32.partialorder %v637_v37, 8.507059e+37 }
  0xe7   : > { %v1054_v22 = vpop.eup %1053 }
  0xe8   : > { %v1056_v23 = vpop.eup %1055  ;;  %v611_v24 = vadd.f32 1.0, %v1054_v22 }
  0xe9   : > { %v1058_v25 = vpop.eup %1057  ;;  %v1454_v26 = vadd.f32 1.0, %v1056_v23 }
  0xea   : > { %v1060_v27 = vpop.eup %1059  ;;  %v614_v28 = vmul.f32 %v1058_v25, %v609_v18  ;;  %1061 = vrcp.f32 %v611_v24  ;;  %vm619_vm1 = vweird.f32 %v1058_v25  ;;  %v654_v54 = vand.u32 2147483648, %v611_v24 }
  0xeb   : > { %v629_v29 = vmul.f32 %v1060_v27, %v610_v21  ;;  %1063 = vrcp.f32 %v1454_v26  ;;  %vm634_vm3 = vweird.f32 %v1060_v27  ;;  %vm620_vm4 = vmor %vm618_vm0, %vm619_vm1  ;;  %v652_v58 = vand.u32 2147483647, %v611_v24 }
  0xec   : > { %v615_v31 = vsub.f32 1.0, %v614_v28  ;;  %vm635_vm6 = vmor %vm633_vm2, %vm634_vm3  ;;  %vm648_vm9 = vweird.f32 %v611_v24  ;;  %v669_v62 = vand.u32 2147483648, %v1454_v26  ;;  %v667_v2 = vand.u32 2147483647, %v1454_v26 }
  0xed   : > { %v630_v34 = vsub.f32 1.0, %v629_v29  ;;  %v655_v5 = vor.u32 1.1754944e-38, %v654_v54  ;;  %vm653_vm12 = vcmp.eq.f32.partialorder %v652_v58, 8.507059e+37  ;;  %vm663_vm13 = vweird.f32 %v1454_v26 }
  0xee   : > { %v616_v35 = vmul.f32 %v1058_v25, %v615_v31  ;;  %vm668_vm15 = vcmp.eq.f32.partialorder %v667_v2, 8.507059e+37 }
  0xef   : > { %v631_v38 = vmul.f32 %v1060_v27, %v630_v34 }
  0xf0   : > { %v1062_v39 = vpop.eup %1061  ;;  %v617_v40 = vadd.f32 %v1058_v25, %v616_v35 }
  0xf1   : > { %v632_v43 = vadd.f32 %v1060_v27, %v631_v38  ;;  %v644_v44 = vmul.f32 %v1062_v39, %v611_v24  ;;  %v1064_v45 = vpop.eup %1063  ;;  %vm649_vm8 = vweird.f32 %v1062_v39 }
  0xf2   : > { %v621_v46 = vsel %vm620_vm4, %v1058_v25, %v617_v40  ;;  %v659_v50 = vmul.f32 %v1064_v45, %v1454_v26  ;;  %vm664_vm10 = vweird.f32 %v1064_v45  ;;  %vm650_vm11 = vmor %vm648_vm9, %vm649_vm8 }
  0xf3   : > { %v626_v47 = vsel %vm623_vm5, %v625_v42, %v621_v46  ;;  %v636_v48 = vsel %vm635_vm6, %v1060_v27, %v632_v43  ;;  %v645_v49 = vsub.f32 1.0, %v644_v44  ;;  %vm665_vm14 = vmor %vm663_vm13, %vm664_vm10 }
  0xf4   : > { %v641_v53 = vsel %vm638_vm7, %v640_v41, %v636_v48  ;;  %v660_v59 = vsub.f32 1.0, %v659_v50  ;;  %v673_v60 = vmul.f32 %v626_v47, %v1440_v51 }
  0xf5   : > { %v646_v57 = vmul.f32 %v1062_v39, %v645_v49  ;;  %v674_v61 = vmul.f32 %v641_v53, %v1442_v52  ;;  %v670_v52 = vor.u32 1.1754944e-38, %v669_v62 }
  0xf6   : > { %v661_v1 = vmul.f32 %v1064_v45, %v660_v59 }
  0xf7   : > { %v647_v63 = vadd.f32 %v1062_v39, %v646_v57  ;;  %v534_v3 = vpop.f32.mrf.mxu0  ;;  %v554_v4 = vpop.f32.mrf.mxu1 }
  0xf8   : > { %v535_v6 = vadd.f32 %v534_v3, %v425_v55  ;;  %v555_v7 = vadd.f32 %v554_v4, %v426_v56  ;;  %v662_v11 = vadd.f32 %v1064_v45, %v661_v1 }
  0xf9   : > { %v651_v8 = vsel %vm650_vm11, %v1062_v39, %v647_v63 }
  0xfa   : > { %v656_v51 = vsel %vm653_vm12, %v655_v5, %v651_v8  ;;  %v677_v0 = vmul.f32 %v673_v60, %v535_v6  ;;  %v678_v12 = vmul.f32 %v674_v61, %v555_v7  ;;  %v666_v13 = vsel %vm665_vm14, %v1064_v45, %v662_v11 }
  0xfb   : > { %v671_v16 = vsel %vm668_vm15, %v670_v52, %v666_v13  ;;  %v675_v17 = vmul.f32 %v656_v51, %v1448_v9 }
  0xfc   : > { %765 = vmatmul.f32.vlgmr.msra.gmra.mxu0 %v677_v0  ;;  %785 = vmatmul.f32.vlgmr.msra.gmra.mxu1 %v678_v12  ;;  %v676_v18 = vmul.f32 %v671_v16, %v1450_v10 }
  0xfe   : > { %v574_v19 = vpop.f32.mrf.mxu2  ;;  %v594_v20 = vpop.f32.mrf.mxu3 }
  0xff   : > { %v575_v21 = vadd.f32 %v574_v19, %v427_v14  ;;  %v595_v22 = vadd.f32 %v594_v20, %v428_v15 }
 0x101   : > { %v679_v23 = vmul.f32 %v675_v17, %v575_v21  ;;  %v680_v24 = vmul.f32 %v676_v18, %v595_v22 }
 0x103   : > { %805 = vmatmul.f32.vlgmr.msra.gmra.mxu2 %v679_v23  ;;  %825 = vmatmul.f32.vlgmr.msra.gmra.mxu3 %v680_v24 }
 0x179   : > { %v766_v25 = vpop.f32.mrf.mxu0  ;;  %v786_v9 = vpop.f32.mrf.mxu1 }
 0x17a   : > { %v767_v26 = vadd.f32 %v1048_v30, %v766_v25 }
 0x17c   : > { %v787_v10 = vadd.f32 %v786_v9, %v767_v26 }
 0x186   : > { %v806_v27 = vpop.f32.mrf.mxu2  ;;  %v826_v29 = vpop.f32.mrf.mxu3 }
 0x187   : > { %v807_v28 = vadd.f32 %v806_v27, %v787_v10 }
 0x189   : > { %v827_v31 = vadd.f32 %v826_v29, %v807_v28 }
 0x18b   : > { %829 = vst [vmem:[%s289_s27] sm:$0xff] %v827_v31 }
 0x18c   : > { %1212 = shalt.err (!%p1209_p9)
}
 0x18d   : > { %981 = dma.vmem_to_hbm [thread:$0]  (%p1374_p13), %s844_s28, 128, %s846_s10, %s831_s25  }
 0x18e PF: > { %s857_s7 = sand.u32 1, %s1247_s18   ;;  %p1519_p10 = scmp.ge.s32.totalorder %s1259_s21, 2 }
 0x18f   : > { %s858_s30 = scalar_lea.sflag [#allocation4], %s857_s7 }
 0x190   : > { %p998_p11 = pnand %p1519_p10, %p1379_p4 }
 0x192   : > { %p999_p0 = pneg %p998_p11 }
 0x194   : > { %1242 = dma.done.wait (%p999_p0), %s858_s30, 128  }
 0x195   : > { %1244 = vsyncadd (%p999_p0), %s858_s30, 4294967168  ;;  %p20_p2 = scmp.ge.s32.totalorder %s1354_s24, 4   ;;  %s1520_s18 = smov %s1251_s19 }
 0x196   : > { %s1521_s19 = smov %s1255_s20  ;;  %s1522_s20 = smov %s1366_s29 }
 0x197   : > { %s1523_s21 = smov %s1354_s24  ;;  %22 = sbr.rel (!%p20_p2) target bundleno = 7 (0x7), region = 97 }
 0x19c   :  { %864 = vsyncpa [#allocation3], 1 }
 0x19d   :  { %866 = vsyncpa [#allocation3 + $0x1], 1 }
 0x19e   :  { %867 = vsyncpa [#allocation6], 1 }
 0x19f   :  { %868 = vsyncpa [#allocation9], 1 }
 0x1a0   :  { %869 = vsyncpa [#allocation4], 1 }
 0x1a1   :  { %871 = vsyncpa [#allocation4 + $0x1], 1 }

</bundles_post_ra>
